<compile_context>
chip_gen: v7x
topology: tpu7x:2x2x1
jax: 0.10.0
libtpu: 0.0.40
codegen_flags: <defaults>
</compile_context>

<pallas_src>
import numpy as np
import jax
import jax.numpy as jnp
from jax.experimental import pallas as pl
from jax.experimental.pallas import tpu as pltpu


def _round_up(n, m):
    return (n + m - 1) // m * m


# ---- hyper-params (mirror the PyTorch module's __init__ arguments) ----------
MAXLEN = 32                          # params_local['MAXLEN']
EMBED = 8                            # embedding width (conv kernel width)
KERNELS = ((4, EMBED), (8, EMBED))   # kernels_tuple
FILTERS = (8, 16)                    # filters_list
TERMS = 16                           # terms_classes
FC_DEPTH = 2                         # params_local['FC_depth']

F_TOTAL = sum(FILTERS)               # 24 (concatenated feature width)
P_PAD = 32                           # pool axis padded to 32 (power of two)
OUT_ROWS = _round_up(TERMS, 8)       # sublane-aligned output rows (16)

assert P_PAD & (P_PAD - 1) == 0
assert all(P_PAD >= MAXLEN - kh + 1 for kh, _ in KERNELS)
assert F_TOTAL % 8 == 0              # halving blocks stay sublane-tile aligned


# ----------------------------- kernel ----------------------------------------
def _model1_kernel(xt_ref, wconv_ref, wout_ref, bout_ref, o_ref):
    # All conv branches / filters / pool positions as one Toeplitz matmul.
    # Rows of `s` are position-major (row = p*F_TOTAL + f), batch on lanes.
    s = jnp.dot(wconv_ref[...], xt_ref[...],
                preferred_element_type=jnp.float32)        # (P_PAD*F_TOTAL, tb)

    # MaxPool2d over sequence positions + torch.cat across branches:
    # log2(P_PAD) halving maxes over contiguous, sublane-tile-aligned row
    # blocks.  Pure VALU; no XLU reductions, rolls or reshapes needed.
    rows = P_PAD * F_TOTAL
    while rows > F_TOTAL:
        rows //= 2
        s = jnp.maximum(s[:rows, :], s[rows:2 * rows, :])
    feat = s.astype(jnp.bfloat16)                          # (F_TOTAL, tb)

    # Activation-free FC stack + output layer, pre-folded into one affine map
    # (conv biases already folded into bout host-side).
    net = jnp.dot(wout_ref[...], feat,
                  preferred_element_type=jnp.float32)      # (OUT_ROWS, tb)
    o_ref[...] = jax.nn.sigmoid(net + bout_ref[...])       # f32 EUP path


# ------------------------- parameter handling --------------------------------
def init_params(key):
    """Deterministic synthetic parameters (shapes match the nn.Module).

    Layout notes vs PyTorch:
      torch Conv2d weight (F, 1, kh, D)  -> stored here as (kh, D, F)
      torch Linear weight (out, in)      -> stored here as (in, out)
    """
    conv_ws, conv_bs = [], []
    for (kh, kw), F in zip(KERNELS, FILTERS):
        key, k1, k2 = jax.random.split(key, 3)
        conv_ws.append(0.1 * jax.random.normal(k1, (kh, kw, F), jnp.float32))
        conv_bs.append(0.1 * jax.random.normal(k2, (1, F), jnp.float32))
    fc_ws, fc_bs = [], []
    for i in range(FC_DEPTH):
        key, k1, k2 = jax.random.split(key, 3)
        d_in = F_TOTAL if i == 0 else TERMS
        fc_ws.append(0.1 * jax.random.normal(k1, (d_in, TERMS), jnp.float32))
        fc_bs.append(0.1 * jax.random.normal(k2, (1, TERMS), jnp.float32))
    key, k1, k2 = jax.random.split(key, 3)
    out_in = TERMS if FC_DEPTH > 0 else F_TOTAL
    out_w = 0.1 * jax.random.normal(k1, (out_in, TERMS), jnp.float32)
    out_b = 0.1 * jax.random.normal(k2, (1, TERMS), jnp.float32)
    return conv_ws, conv_bs, fc_ws, fc_bs, out_w, out_b


def prepare_params(params):
    """One-time host-side fold of the module into two matmuls' worth of weights."""
    conv_ws, conv_bs, fc_ws, fc_bs, out_w, out_b = params
    L, D = MAXLEN, EMBED

    # Transposed Toeplitz conv weight: row p*F_TOTAL + f holds filter f's kernel
    # placed at sequence offset p, flattened over (L*D).  Pool-pad positions
    # (p >= P_f) duplicate position 0 so the later 32-way max never sees a
    # spurious value.  Conv biases are NOT baked in: max_p(x+b) == max_p(x)+b,
    # so they are folded past the pool into `bout` below.
    wconv = np.zeros((P_PAD * F_TOTAL, L * D), np.float32)
    off = 0
    for (kh, _kw), F, w in zip(KERNELS, FILTERS, conv_ws):
        P = L - kh + 1
        w = np.asarray(w)                      # (kh, D, F)
        for f in range(F):
            for p in range(P_PAD):
                p_src = p if p < P else 0      # duplicate a valid column in pads
                row = p * F_TOTAL + (off + f)
                for j in range(kh):
                    wconv[row, (p_src + j) * D:(p_src + j + 1) * D] = w[j, :, f]
        off += F

    bconv = np.concatenate([np.asarray(b).reshape(-1) for b in conv_bs])  # (F_TOTAL,)

    # Fold the activation-free FC chain + output layer into one affine map.
    if FC_DEPTH > 0:
        W_eff = np.asarray(fc_ws[0])
        b_eff = np.asarray(fc_bs[0]).reshape(1, -1)
        for W, b in zip(fc_ws[1:], fc_bs[1:]):
            W = np.asarray(W)
            b = np.asarray(b).reshape(1, -1)
            b_eff = b_eff @ W + b
            W_eff = W_eff @ W
        b_eff = b_eff @ np.asarray(out_w) + np.asarray(out_b).reshape(1, -1)
        W_eff = W_eff @ np.asarray(out_w)
    else:
        W_eff = np.asarray(out_w)
        b_eff = np.asarray(out_b).reshape(1, -1)

    # Fold the conv biases through the affine map; transpose for lanes=batch.
    b_full = (bconv.reshape(1, -1) @ W_eff + b_eff).reshape(-1)   # (TERMS,)

    wout = np.zeros((OUT_ROWS, F_TOTAL), np.float32)
    wout[:TERMS, :] = W_eff.T
    bout = np.zeros((OUT_ROWS, 1), np.float32)
    bout[:TERMS, 0] = b_full

    return (jnp.asarray(wconv, jnp.bfloat16),   # MXU operand -> bf16
            jnp.asarray(wout, jnp.bfloat16),    # MXU operand -> bf16
            jnp.asarray(bout, jnp.float32))     # elementwise stays f32 (v5e)


# ------------------------------ wrapper ---------------------------------------
def model1_forward(x, prepared, *, block_b=1024):
    wconv, wout, bout = prepared
    B, L, D = x.shape
    assert (L, D) == (MAXLEN, EMBED)

    # Batch lives on the lane axis -> tiles are multiples of 128.
    b_min = _round_up(B, 128)
    tb = min(_round_up(block_b, 128), b_min)
    # v7x megacore: keep >=2 grid steps when the batch is big enough, and bound
    # batch-padding waste to ~one lane tile per step.
    if b_min >= 2 * 128 and tb > b_min // 2:
        tb = _round_up(b_min // 2, 128)
    b_pad = _round_up(B, tb)

    x_flat = x.reshape(B, L * D)
    if b_pad != B:
        x_flat = jnp.pad(x_flat, ((0, b_pad - B), (0, 0)))
    xt = x_flat.astype(jnp.bfloat16).T                     # (L*D, b_pad)

    cols = P_PAD * F_TOTAL
    cost = pl.CostEstimate(
        flops=2 * b_pad * (L * D) * cols + 2 * b_pad * F_TOTAL * OUT_ROWS,
        transcendentals=b_pad * OUT_ROWS,
        bytes_accessed=(b_pad * (L * D) * 2 + wconv.size * 2 + wout.size * 2
                        + bout.size * 4 + b_pad * OUT_ROWS * 4),
    )

    out = pl.pallas_call(
        _model1_kernel,
        out_shape=jax.ShapeDtypeStruct((OUT_ROWS, b_pad), jnp.float32),
        grid=(b_pad // tb,),
        in_specs=[
            pl.BlockSpec((L * D, tb), lambda i: (0, i)),          # x^T (pipelined)
            pl.BlockSpec((cols, L * D), lambda i: (0, 0)),        # Toeplitz conv W
            pl.BlockSpec((OUT_ROWS, F_TOTAL), lambda i: (0, 0)),  # folded FC W^T
            pl.BlockSpec((OUT_ROWS, 1), lambda i: (0, 0)),        # folded bias
        ],
        out_specs=pl.BlockSpec((OUT_ROWS, tb), lambda i: (0, i)), # dense slab
        compiler_params=pltpu.CompilerParams(
            dimension_semantics=("parallel",)),
        cost_estimate=cost,
    )(xt, wconv, wout, bout)

    return out[:TERMS, :B].T


# ------------------------------ reference -------------------------------------
def reference(x, params):
    """Pure-JAX f32 mirror of the PyTorch forward (per-tap conv, unfused FCs)."""
    conv_ws, conv_bs, fc_ws, fc_bs, out_w, out_b = params
    feats = []
    for (kh, _kw), W, b in zip(KERNELS, conv_ws, conv_bs):
        P = x.shape[1] - kh + 1
        s = sum(jnp.einsum('bpd,df->bpf', x[:, j:j + P, :], W[j])
                for j in range(kh)) + b.reshape(1, 1, -1)
        feats.append(jnp.max(s, axis=1))
    net = jnp.concatenate(feats, axis=1)
    for W, b in zip(fc_ws, fc_bs):
        net = net @ W + b
    net = net @ out_w + out_b
    return jax.nn.sigmoid(net)


if __name__ == "__main__":
    key = jax.random.PRNGKey(0)
    kx, kp = jax.random.split(key)
    B = 8
    x = jax.random.normal(kx, (B, MAXLEN, EMBED), jnp.float32)
    params = init_params(kp)
    prepared = prepare_params(params)

    out = jax.block_until_ready(model1_forward(x, prepared))
    ref = jax.block_until_ready(reference(x, params))

    np.testing.assert_allclose(np.asarray(out), np.asarray(ref),
                               rtol=1e-2, atol=1e-2)
    assert out.shape == (B, TERMS)
    print("KERNEL_OK")
</pallas_src>

<mosaic_0001>
module attributes {stable_mosaic.version = 11 : i64} {
  func.func @_model1_kernel(%arg0: i32, %arg1: memref<256x128xbf16, #tpu.memory_space<vmem>>, %arg2: memref<768x256xbf16, #tpu.memory_space<vmem>>, %arg3: memref<16x24xbf16, #tpu.memory_space<vmem>>, %arg4: memref<16x1xf32, #tpu.memory_space<vmem>>, %arg5: memref<16x128xf32, #tpu.memory_space<vmem>>) attributes {dimension_semantics = [#tpu.dimension_semantics<parallel>], iteration_bounds = array<i64: 1>, scalar_prefetch = 0 : i64, scratch_operands = 0 : i64, tpu.core_type = #tpu.core_type<tc>, window_params = [{transform_indices = @transform_0, window_bounds = array<i64: 256, 128>}, {pipeline_mode = #tpu.pipeline_mode<synchronous>, transform_indices = @transform_1, window_bounds = array<i64: 768, 256>}, {pipeline_mode = #tpu.pipeline_mode<synchronous>, transform_indices = @transform_2, window_bounds = array<i64: 16, 24>}, {pipeline_mode = #tpu.pipeline_mode<synchronous>, transform_indices = @transform_3, window_bounds = array<i64: 16, 1>}, {transform_indices = @transform_4, window_bounds = array<i64: 16, 128>}]} {
    %c0 = arith.constant 0 : index
    %c0_0 = arith.constant 0 : index
    %0 = vector.load %arg2[%c0, %c0_0] : memref<768x256xbf16, #tpu.memory_space<vmem>>, vector<768x256xbf16>
    %c0_1 = arith.constant 0 : index
    %c0_2 = arith.constant 0 : index
    %1 = vector.load %arg1[%c0_1, %c0_2] : memref<256x128xbf16, #tpu.memory_space<vmem>>, vector<256x128xbf16>
    %cst = arith.constant dense<0.000000e+00> : vector<768x128xf32>
    %2 = tpu.matmul %0, %1, %cst {dimension_numbers = #tpu.dot_dimension_numbers<[1], [0], [0], [1], [0, 0, 1, 1], [], []>} : vector<768x256xbf16>, vector<256x128xbf16>, vector<768x128xf32> -> vector<768x128xf32>
    %3 = vector.extract_strided_slice %2 {offsets = [0, 0], sizes = [384, 128], strides = [1, 1]} : vector<768x128xf32> to vector<384x128xf32>
    %4 = vector.extract_strided_slice %2 {offsets = [384, 0], sizes = [384, 128], strides = [1, 1]} : vector<768x128xf32> to vector<384x128xf32>
    %5 = arith.maximumf %3, %4 : vector<384x128xf32>
    %6 = vector.extract_strided_slice %5 {offsets = [0, 0], sizes = [192, 128], strides = [1, 1]} : vector<384x128xf32> to vector<192x128xf32>
    %7 = vector.extract_strided_slice %5 {offsets = [192, 0], sizes = [192, 128], strides = [1, 1]} : vector<384x128xf32> to vector<192x128xf32>
    %8 = arith.maximumf %6, %7 : vector<192x128xf32>
    %9 = vector.extract_strided_slice %8 {offsets = [0, 0], sizes = [96, 128], strides = [1, 1]} : vector<192x128xf32> to vector<96x128xf32>
    %10 = vector.extract_strided_slice %8 {offsets = [96, 0], sizes = [96, 128], strides = [1, 1]} : vector<192x128xf32> to vector<96x128xf32>
    %11 = arith.maximumf %9, %10 : vector<96x128xf32>
    %12 = vector.extract_strided_slice %11 {offsets = [0, 0], sizes = [48, 128], strides = [1, 1]} : vector<96x128xf32> to vector<48x128xf32>
    %13 = vector.extract_strided_slice %11 {offsets = [48, 0], sizes = [48, 128], strides = [1, 1]} : vector<96x128xf32> to vector<48x128xf32>
    %14 = arith.maximumf %12, %13 : vector<48x128xf32>
    %15 = vector.extract_strided_slice %14 {offsets = [0, 0], sizes = [24, 128], strides = [1, 1]} : vector<48x128xf32> to vector<24x128xf32>
    %16 = vector.extract_strided_slice %14 {offsets = [24, 0], sizes = [24, 128], strides = [1, 1]} : vector<48x128xf32> to vector<24x128xf32>
    %17 = arith.maximumf %15, %16 : vector<24x128xf32>
    %18 = arith.truncf %17 : vector<24x128xf32> to vector<24x128xbf16>
    %c0_3 = arith.constant 0 : index
    %c0_4 = arith.constant 0 : index
    %19 = vector.load %arg3[%c0_3, %c0_4] : memref<16x24xbf16, #tpu.memory_space<vmem>>, vector<16x24xbf16>
    %cst_5 = arith.constant dense<0.000000e+00> : vector<16x128xf32>
    %20 = tpu.matmul %19, %18, %cst_5 {dimension_numbers = #tpu.dot_dimension_numbers<[1], [0], [0], [1], [0, 0, 1, 1], [], []>} : vector<16x24xbf16>, vector<24x128xbf16>, vector<16x128xf32> -> vector<16x128xf32>
    %c0_6 = arith.constant 0 : index
    %c0_7 = arith.constant 0 : index
    %21 = vector.load %arg4[%c0_6, %c0_7] : memref<16x1xf32, #tpu.memory_space<vmem>>, vector<16x1xf32>
    %22 = vector.broadcast %21 : vector<16x1xf32> to vector<16x128xf32>
    %23 = arith.addf %20, %22 : vector<16x128xf32>
    %24 = arith.negf %23 : vector<16x128xf32>
    %25 = math.exp %24 : vector<16x128xf32>
    %cst_8 = arith.constant 1.000000e+00 : f32
    %26 = vector.broadcast %cst_8 : f32 to vector<16x128xf32>
    %27 = arith.addf %26, %25 : vector<16x128xf32>
    %28 = arith.divf %26, %27 : vector<16x128xf32>
    %c0_9 = arith.constant 0 : index
    %c0_10 = arith.constant 0 : index
    %29 = vector.load %arg5[%c0_9, %c0_10] : memref<16x128xf32, #tpu.memory_space<vmem>>, vector<16x128xf32>
    tpu.vector_store %arg5[%c0_9, %c0_10], %28 {strides = array<i32>} : memref<16x128xf32, #tpu.memory_space<vmem>>, vector<16x128xf32>,
    return
  }
  func.func @transform_0(%arg0: i32) -> (i32, i32) {
    %c0_i32 = arith.constant 0 : i32
    %c0_i32_0 = arith.constant 0 : i32
    return %c0_i32, %arg0 : i32, i32
  }
  func.func @transform_1(%arg0: i32) -> (i32, i32) {
    %c0_i32 = arith.constant 0 : i32
    %c0_i32_0 = arith.constant 0 : i32
    %c0_i32_1 = arith.constant 0 : i32
    return %c0_i32, %c0_i32_0 : i32, i32
  }
  func.func @transform_2(%arg0: i32) -> (i32, i32) {
    %c0_i32 = arith.constant 0 : i32
    %c0_i32_0 = arith.constant 0 : i32
    %c0_i32_1 = arith.constant 0 : i32
    return %c0_i32, %c0_i32_0 : i32, i32
  }
  func.func @transform_3(%arg0: i32) -> (i32, i32) {
    %c0_i32 = arith.constant 0 : i32
    %c0_i32_0 = arith.constant 0 : i32
    %c0_i32_1 = arith.constant 0 : i32
    return %c0_i32, %c0_i32_0 : i32, i32
  }
  func.func @transform_4(%arg0: i32) -> (i32, i32) {
    %c0_i32 = arith.constant 0 : i32
    %c0_i32_0 = arith.constant 0 : i32
    return %c0_i32, %arg0 : i32, i32
  }
}

</mosaic_0001>

<bundles_post_ra>
// kernel: tpu_custom_call.1
= control target key start
LH: loop header
LB: loop body
LE: loop exit
PB: predicated region body
PF: predicated region fallthrough
CT: control target
= control target key end

     0   :  { %9 = vsyncpa [#allocation3], 0  ;;  %s1896_s0 = inlined_call_operand.hbm [shape: bf16[256,128], index: 0, kind: input, shape index: {}]   ;;  %s1897_s1 = inlined_call_operand.hbm [shape: bf16[768,256], index: 1, kind: input, shape index: {}]   ;;  %s1898_s2 = inlined_call_operand.vmem [shape: bf16[16,24], index: 2, kind: input, shape index: {}]   ;;  %s1899_s3 = inlined_call_operand.vmem [shape: f32[16,1], index: 3, kind: input, shape index: {}]   ;;  %s1900_s4 = inlined_call_operand.hbm [shape: f32[16,128], index: 4, kind: output, shape index: {}]  }
   0x1   :  { %10 = vsyncpa [#allocation6], 0 }
   0x2   :  { %11 = vsyncpa [#allocation4], 0  ;;  %s1774_s15 = smov [#allocation2]   ;;  %s1702_s19 = scalar_lea.hbm %s1896_s0, 2048 }
   0x3   :  { %s17_s16 = sshll.u32 %s1774_s15, 4  ;;  %p1703_p0 = scmp.ne.s32.totalorder %s1896_s0, %s1702_s19  ;;  %s18_s16 = int_to_ptr.vmem [resolvable:$true] %s17_s16 }
   0x4   :  { %p1706_p1 = scmp.lt.u32.totalorder %s1702_s19, %s1896_s0 }
   0x6   :  { %p1708_p2 = pnand %p1706_p1, %p1703_p0 }
   0x8   :  { %1711 = shalt.err (!%p1708_p2)
}
   0x9   :  { %s1712_s24 = scalar_lea.vmem %s18_s16, 2048  ;;  %p1717_p4 = scmp.lt.s32.totalorder %s18_s16, %s18_s16 }
   0xa   :  { %p1713_p3 = scmp.ne.s32.totalorder %s18_s16, %s1712_s24  ;;  %p1718_p5 = scmp.lt.s32.totalorder %s1712_s24, %s1712_s24 }
   0xc   :  { %p1719_p6 = por %p1718_p5, %p1717_p4 }
   0xe   :  { %p1720_p7 = pnand %p1719_p6, %p1713_p3 }
  0x10   :  { %1723 = shalt.err (!%p1720_p7)
}
  0x11   :  { %s1775_s25 = smov 64   ;;  %s1776_s26 = smov 4  }
  0x12   :  { %23 = dma.hbm_to_vmem [thread:$0]  %s1896_s0, 2048, %s18_s16, [#allocation3], %s1775_s25, %s1775_s25, %s1776_s26  }
  0x13   :  { %s1777_s29 = smov [#allocation5]   ;;  %s1724_s7 = scalar_lea.hbm %s1897_s1, 12288 }
  0x14   :  { %s29_s30 = sshll.u32 %s1777_s29, 4  ;;  %p1725_p8 = scmp.ne.s32.totalorder %s1897_s1, %s1724_s7  ;;  %s30_s30 = int_to_ptr.vmem [resolvable:$true] %s29_s30 }
  0x15   :  { %p1728_p9 = scmp.lt.u32.totalorder %s1724_s7, %s1897_s1 }
  0x17   :  { %p1730_p10 = pnand %p1728_p9, %p1725_p8 }
  0x19   :  { %1733 = shalt.err (!%p1730_p10)
}
  0x1a   :  { %s1734_s12 = scalar_lea.vmem %s30_s30, 12288  ;;  %p1739_p12 = scmp.lt.s32.totalorder %s30_s30, %s30_s30 }
  0x1b   :  { %p1735_p11 = scmp.ne.s32.totalorder %s30_s30, %s1734_s12  ;;  %p1740_p13 = scmp.lt.s32.totalorder %s1734_s12, %s1734_s12 }
  0x1d   :  { %p1741_p0 = por %p1740_p13, %p1739_p12 }
  0x1f   :  { %p1742_p1 = pnand %p1741_p0, %p1735_p11 }
  0x21   :  { %1745 = shalt.err (!%p1742_p1)
}
  0x22   :  { %s1778_s0 = smov 128   ;;  %s1779_s13 = smov 8  }
  0x23   :  { %35 = dma.hbm_to_vmem [thread:$0]  %s1897_s1, 12288, %s30_s30, [#allocation6], %s1778_s0, %s1778_s0, %s1779_s13  }
  0x24   :  { %1768 = dma.done.wait [#allocation3], 2048  }
  0x25   :  { %1769 = vsyncadd [#allocation3], 4294965248 }
  0x26   :  { %1770 = dma.done.wait [#allocation6], 12288  }
  0x27   :  { %1771 = vsyncadd [#allocation6], 4294955008  ;;  %v1780_v0 = vmov 0   ;;  %v1533_v1 = vld [vmem:[#allocation2] sm:$0xff]   ;;  %v1534_v2 = vld [vmem:[#allocation2 + $0x8] sm:$0xff]   ;;  %vm1782_vm0 = vmmov 0  }
  0x28   :  { %751 = vmatprep.subr.bf16.mxu0 %v1780_v0  ;;  %1490 = vmatprep.subr.bf16.mxu1 %v1780_v0  ;;  %v1535_v3 = vld [vmem:[#allocation2 + $0x10] sm:$0xff]   ;;  %v1536_v4 = vld [vmem:[#allocation2 + $0x18] sm:$0xff]   ;;  %v1537_v5 = vld [vmem:[#allocation2 + $0x20] sm:$0xff]   ;;  %vm1286_vm1 = vcmask 1043456   ;;  %vm1282_vm2 = vcmask 195584  }
  0x29   :  { %1532 = vset.pattern.permute.xlu0 %v1780_v0  ;;  %752 = vmatpush1.bf16.msra.mxu0 %v1533_v1  ;;  %v1551_v6 = vld [vmem:[#allocation5 + $0x4] ss:$8 sps:$4 sm:$0xff]   ;;  %v1556_v8 = vld [vmem:[#allocation5 + $0x194] ss:$8 sps:$4 sm:$0xff]   ;;  %v1549_v19 = vld [vmem:[#allocation5] ss:$8 sps:$4 sm:$0xff]  }
  0x2a   :  { %1506 = vmatpush1.bf16.msra.mxu1 %v1533_v1  ;;  %753 = vmatprep.subr.bf16.mxu0 %v1780_v0  ;;  %v1538_v7 = vld [vmem:[#allocation2 + $0x28] sm:$0xff]   ;;  %v1539_v9 = vld [vmem:[#allocation2 + $0x30] sm:$0xff]   ;;  %v1540_v10 = vld [vmem:[#allocation2 + $0x38] sm:$0xff]  }
  0x2b   :  { %1491 = vmatprep.subr.bf16.mxu1 %v1780_v0  ;;  %783 = vmatprep.mubr.bf16.mxu0 %v1551_v6  ;;  %v1541_v11 = vld [vmem:[#allocation2 + $0x40] sm:$0xff]   ;;  %v1542_v12 = vld [vmem:[#allocation2 + $0x48] sm:$0xff]   ;;  %v1543_v13 = vld [vmem:[#allocation2 + $0x50] sm:$0xff]  }
  0x2c   :  { %983 = vmatprep.mubr.bf16.mxu1 %v1556_v8  ;;  %v1544_v14 = vld [vmem:[#allocation2 + $0x58] sm:$0xff]   ;;  %v1545_v15 = vld [vmem:[#allocation2 + $0x60] sm:$0xff]   ;;  %v1546_v16 = vld [vmem:[#allocation2 + $0x68] sm:$0xff]  }
  0x2d   :  { %754 = vmatpush1.bf16.msra.mxu0 %v1534_v2  ;;  %v1547_v17 = vld [vmem:[#allocation2 + $0x70] sm:$0xff]   ;;  %v1548_v18 = vld [vmem:[#allocation2 + $0x78] sm:$0xff]   ;;  %v1560_v22 = vld [vmem:[#allocation5 + $0x1a4] ss:$8 sps:$4 sm:$0xff]  }
  0x2e   :  { %1507 = vmatpush1.bf16.msra.mxu1 %v1534_v2  ;;  %755 = vmatprep.subr.bf16.mxu0 %v1780_v0  ;;  %v1554_v20 = vld [vmem:[#allocation5 + $0x190] ss:$8 sps:$4 sm:$0xff]   ;;  %v1552_v21 = vld [vmem:[#allocation5 + $0x14] ss:$8 sps:$4 sm:$0xff]   ;;  %v1563_v24 = vld [vmem:[#allocation5 + $0x1a0] ss:$8 sps:$4 sm:$0xff]  }
  0x2f   :  { %1492 = vmatprep.subr.bf16.mxu1 %v1780_v0  ;;  %v1557_v23 = vld [vmem:[#allocation5 + $0x10] ss:$8 sps:$4 sm:$0xff]   ;;  %v1558_v25 = vld [vmem:[#allocation5 + $0x24] ss:$8 sps:$4 sm:$0xff]   ;;  %v1566_v26 = vld [vmem:[#allocation5 + $0x1b4] ss:$8 sps:$4 sm:$0xff]  }
  0x30   :  { %v1562_v27 = vld [vmem:[#allocation5 + $0x20] ss:$8 sps:$4 sm:$0xff]   ;;  %v1569_v28 = vld [vmem:[#allocation5 + $0x1b0] ss:$8 sps:$4 sm:$0xff]   ;;  %v1564_v29 = vld [vmem:[#allocation5 + $0x34] ss:$8 sps:$4 sm:$0xff]  }
  0x31   :  { %756 = vmatpush1.bf16.msra.mxu0 %v1535_v3  ;;  %v1572_v30 = vld [vmem:[#allocation5 + $0x1c4] ss:$8 sps:$4 sm:$0xff]   ;;  %v1568_v31 = vld [vmem:[#allocation5 + $0x30] ss:$8 sps:$4 sm:$0xff]   ;;  %v1575_v32 = vld [vmem:[#allocation5 + $0x1c0] ss:$8 sps:$4 sm:$0xff]  }
  0x32   :  { %1508 = vmatpush1.bf16.msra.mxu1 %v1535_v3  ;;  %757 = vmatprep.subr.bf16.mxu0 %v1780_v0  ;;  %v1570_v33 = vld [vmem:[#allocation5 + $0x44] ss:$8 sps:$4 sm:$0xff]   ;;  %v1578_v34 = vld [vmem:[#allocation5 + $0x1d4] ss:$8 sps:$4 sm:$0xff]   ;;  %v1574_v35 = vld [vmem:[#allocation5 + $0x40] ss:$8 sps:$4 sm:$0xff]  }
  0x33   :  { %1493 = vmatprep.subr.bf16.mxu1 %v1780_v0  ;;  %v1581_v36 = vld [vmem:[#allocation5 + $0x1d0] ss:$8 sps:$4 sm:$0xff]   ;;  %v1576_v37 = vld [vmem:[#allocation5 + $0x54] ss:$8 sps:$4 sm:$0xff]   ;;  %v1584_v38 = vld [vmem:[#allocation5 + $0x1e4] ss:$8 sps:$4 sm:$0xff]  }
  0x34   :  { %v1580_v39 = vld [vmem:[#allocation5 + $0x50] ss:$8 sps:$4 sm:$0xff]   ;;  %v1587_v40 = vld [vmem:[#allocation5 + $0x1e0] ss:$8 sps:$4 sm:$0xff]   ;;  %v1582_v41 = vld [vmem:[#allocation5 + $0x64] ss:$8 sps:$4 sm:$0xff]  }
  0x35   :  { %758 = vmatpush1.bf16.msra.mxu0 %v1536_v4  ;;  %v1590_v42 = vld [vmem:[#allocation5 + $0x1f4] ss:$8 sps:$4 sm:$0xff]   ;;  %v1586_v43 = vld [vmem:[#allocation5 + $0x60] ss:$8 sps:$4 sm:$0xff]   ;;  %v1593_v44 = vld [vmem:[#allocation5 + $0x1f0] ss:$8 sps:$4 sm:$0xff]  }
  0x36   :  { %1509 = vmatpush1.bf16.msra.mxu1 %v1536_v4  ;;  %759 = vmatprep.subr.bf16.mxu0 %v1780_v0  ;;  %v1588_v45 = vld [vmem:[#allocation5 + $0x74] ss:$8 sps:$4 sm:$0xff]   ;;  %v1596_v46 = vld [vmem:[#allocation5 + $0x204] ss:$8 sps:$4 sm:$0xff]   ;;  %v1592_v47 = vld [vmem:[#allocation5 + $0x70] ss:$8 sps:$4 sm:$0xff]  }
  0x37   :  { %1494 = vmatprep.subr.bf16.mxu1 %v1780_v0  ;;  %v1599_v48 = vld [vmem:[#allocation5 + $0x200] ss:$8 sps:$4 sm:$0xff]   ;;  %v1594_v49 = vld [vmem:[#allocation5 + $0x84] ss:$8 sps:$4 sm:$0xff]   ;;  %v1602_v50 = vld [vmem:[#allocation5 + $0x214] ss:$8 sps:$4 sm:$0xff]  }
  0x38   :  { %v1598_v51 = vld [vmem:[#allocation5 + $0x80] ss:$8 sps:$4 sm:$0xff]   ;;  %v1605_v52 = vld [vmem:[#allocation5 + $0x210] ss:$8 sps:$4 sm:$0xff]   ;;  %v1600_v53 = vld [vmem:[#allocation5 + $0x94] ss:$8 sps:$4 sm:$0xff]  }
  0x39   :  { %760 = vmatpush1.bf16.msra.mxu0 %v1537_v5  ;;  %v1608_v54 = vld [vmem:[#allocation5 + $0x224] ss:$8 sps:$4 sm:$0xff]   ;;  %v1604_v55 = vld [vmem:[#allocation5 + $0x90] ss:$8 sps:$4 sm:$0xff]   ;;  %v1611_v56 = vld [vmem:[#allocation5 + $0x220] ss:$8 sps:$4 sm:$0xff]  }
  0x3a   :  { %1510 = vmatpush1.bf16.msra.mxu1 %v1537_v5  ;;  %761 = vmatprep.subr.bf16.mxu0 %v1780_v0  ;;  %v1606_v57 = vld [vmem:[#allocation5 + $0xa4] ss:$8 sps:$4 sm:$0xff]   ;;  %v1614_v58 = vld [vmem:[#allocation5 + $0x234] ss:$8 sps:$4 sm:$0xff]   ;;  %v1610_v59 = vld [vmem:[#allocation5 + $0xa0] ss:$8 sps:$4 sm:$0xff]  }
  0x3b   :  { %1495 = vmatprep.subr.bf16.mxu1 %v1780_v0  ;;  %v1617_v60 = vld [vmem:[#allocation5 + $0x230] ss:$8 sps:$4 sm:$0xff]   ;;  %v1612_v61 = vld [vmem:[#allocation5 + $0xb4] ss:$8 sps:$4 sm:$0xff]   ;;  %v1620_v62 = vld [vmem:[#allocation5 + $0x244] ss:$8 sps:$4 sm:$0xff]  }
  0x3c   :  { %v1616_v63 = vld [vmem:[#allocation5 + $0xb0] ss:$8 sps:$4 sm:$0xff]   ;;  %v1618_v1 = vld [vmem:[#allocation5 + $0xc4] ss:$8 sps:$4 sm:$0xff]   ;;  %v1626_v2 = vld [vmem:[#allocation5 + $0x254] ss:$8 sps:$4 sm:$0xff]  }
  0x3d   :  { %762 = vmatpush1.bf16.msra.mxu0 %v1538_v7  ;;  %v1622_v3 = vld [vmem:[#allocation5 + $0xc0] ss:$8 sps:$4 sm:$0xff]   ;;  %v1629_v4 = vld [vmem:[#allocation5 + $0x250] ss:$8 sps:$4 sm:$0xff]   ;;  %v1624_v5 = vld [vmem:[#allocation5 + $0xd4] ss:$8 sps:$4 sm:$0xff]  }
  0x3e   :  { %1511 = vmatpush1.bf16.msra.mxu1 %v1538_v7  ;;  %763 = vmatprep.subr.bf16.mxu0 %v1780_v0  ;;  %v1632_v6 = vld [vmem:[#allocation5 + $0x264] ss:$8 sps:$4 sm:$0xff]   ;;  %v1628_v7 = vld [vmem:[#allocation5 + $0xd0] ss:$8 sps:$4 sm:$0xff]   ;;  %v1635_v8 = vld [vmem:[#allocation5 + $0x260] ss:$8 sps:$4 sm:$0xff]  }
  0x3f   :  { %1496 = vmatprep.subr.bf16.mxu1 %v1780_v0 }
  0x41   :  { %764 = vmatpush1.bf16.msra.mxu0 %v1539_v9 }
  0x42   :  { %1512 = vmatpush1.bf16.msra.mxu1 %v1539_v9  ;;  %765 = vmatprep.subr.bf16.mxu0 %v1780_v0  ;;  %v1630_v9 = vld [vmem:[#allocation5 + $0xe4] ss:$8 sps:$4 sm:$0xff]  }
  0x43   :  { %1497 = vmatprep.subr.bf16.mxu1 %v1780_v0 }
  0x45   :  { %766 = vmatpush1.bf16.msra.mxu0 %v1540_v10 }
  0x46   :  { %1513 = vmatpush1.bf16.msra.mxu1 %v1540_v10  ;;  %767 = vmatprep.subr.bf16.mxu0 %v1780_v0  ;;  %v1638_v10 = vld [vmem:[#allocation5 + $0x274] ss:$8 sps:$4 sm:$0xff]  }
  0x47   :  { %1498 = vmatprep.subr.bf16.mxu1 %v1780_v0 }
  0x49   :  { %768 = vmatpush1.bf16.msra.mxu0 %v1541_v11 }
  0x4a   :  { %1514 = vmatpush1.bf16.msra.mxu1 %v1541_v11  ;;  %769 = vmatprep.subr.bf16.mxu0 %v1780_v0  ;;  %v1634_v11 = vld [vmem:[#allocation5 + $0xe0] ss:$8 sps:$4 sm:$0xff]  }
  0x4b   :  { %1499 = vmatprep.subr.bf16.mxu1 %v1780_v0 }
  0x4d   :  { %770 = vmatpush1.bf16.msra.mxu0 %v1542_v12 }
  0x4e   :  { %1515 = vmatpush1.bf16.msra.mxu1 %v1542_v12  ;;  %771 = vmatprep.subr.bf16.mxu0 %v1780_v0  ;;  %v1641_v12 = vld [vmem:[#allocation5 + $0x270] ss:$8 sps:$4 sm:$0xff]  }
  0x4f   :  { %1500 = vmatprep.subr.bf16.mxu1 %v1780_v0 }
  0x51   :  { %772 = vmatpush1.bf16.msra.mxu0 %v1543_v13 }
  0x52   :  { %1516 = vmatpush1.bf16.msra.mxu1 %v1543_v13  ;;  %773 = vmatprep.subr.bf16.mxu0 %v1780_v0  ;;  %v1636_v13 = vld [vmem:[#allocation5 + $0xf4] ss:$8 sps:$4 sm:$0xff]  }
  0x53   :  { %1501 = vmatprep.subr.bf16.mxu1 %v1780_v0 }
  0x55   :  { %774 = vmatpush1.bf16.msra.mxu0 %v1544_v14 }
  0x56   :  { %1517 = vmatpush1.bf16.msra.mxu1 %v1544_v14  ;;  %775 = vmatprep.subr.bf16.mxu0 %v1780_v0  ;;  %v1644_v14 = vld [vmem:[#allocation5 + $0x284] ss:$8 sps:$4 sm:$0xff]  }
  0x57   :  { %1502 = vmatprep.subr.bf16.mxu1 %v1780_v0 }
  0x59   :  { %776 = vmatpush1.bf16.msra.mxu0 %v1545_v15 }
  0x5a   :  { %1518 = vmatpush1.bf16.msra.mxu1 %v1545_v15  ;;  %777 = vmatprep.subr.bf16.mxu0 %v1780_v0  ;;  %v1640_v15 = vld [vmem:[#allocation5 + $0xf0] ss:$8 sps:$4 sm:$0xff]  }
  0x5b   :  { %1503 = vmatprep.subr.bf16.mxu1 %v1780_v0 }
  0x5d   :  { %778 = vmatpush1.bf16.msra.mxu0 %v1546_v16 }
  0x5e   :  { %1519 = vmatpush1.bf16.msra.mxu1 %v1546_v16  ;;  %779 = vmatprep.subr.bf16.mxu0 %v1780_v0  ;;  %v1647_v16 = vld [vmem:[#allocation5 + $0x280] ss:$8 sps:$4 sm:$0xff]  }
  0x5f   :  { %1504 = vmatprep.subr.bf16.mxu1 %v1780_v0 }
  0x61   :  { %780 = vmatpush1.bf16.msra.mxu0 %v1547_v17 }
  0x62   :  { %1520 = vmatpush1.bf16.msra.mxu1 %v1547_v17  ;;  %781 = vmatprep.subr.bf16.mxu0 %v1780_v0  ;;  %v1642_v17 = vld [vmem:[#allocation5 + $0x104] ss:$8 sps:$4 sm:$0xff]  }
  0x63   :  { %1505 = vmatprep.subr.bf16.mxu1 %v1780_v0  ;;  %v1623_v0 = vld [vmem:[#allocation5 + $0x240] ss:$8 sps:$4 sm:$0xff]  }
  0x65   :  { %782 = vmatpush1.bf16.msra.mxu0 %v1548_v18 }
  0x66   :  { %1521 = vmatpush1.bf16.msra.mxu1 %v1548_v18  ;;  %v1650_v18 = vld [vmem:[#allocation5 + $0x294] ss:$8 sps:$4 sm:$0xff]  }
  0x68   :  { %784 = vmatmul.mubr.bf16.vlgmr.msra.gmra.mrb[0].mxu0 %v1549_v19  ;;  %v1646_v19 = vld [vmem:[#allocation5 + $0x100] ss:$8 sps:$4 sm:$0xff]  }
  0x69   :  { %984 = vmatmul.mubr.bf16.vlgmr.msra.gmra.mrb[0].mxu1 %v1554_v20  ;;  %791 = vmatprep.mubr.bf16.mxu0 %v1552_v21  ;;  %v1653_v20 = vld [vmem:[#allocation5 + $0x290] ss:$8 sps:$4 sm:$0xff]   ;;  %v1648_v21 = vld [vmem:[#allocation5 + $0x114] ss:$8 sps:$4 sm:$0xff]  }
  0x6a   :  { %991 = vmatprep.mubr.bf16.mxu1 %v1560_v22  ;;  %v1656_v22 = vld [vmem:[#allocation5 + $0x2a4] ss:$8 sps:$4 sm:$0xff]  }
  0x70   :  { %792 = vmatmul.mubr.bf16.gmra.mrb[4].mxu0 %v1557_v23  ;;  %v1652_v23 = vld [vmem:[#allocation5 + $0x110] ss:$8 sps:$4 sm:$0xff]  }
  0x71   :  { %992 = vmatmul.mubr.bf16.gmra.mrb[4].mxu1 %v1563_v24  ;;  %799 = vmatprep.mubr.bf16.mxu0 %v1558_v25  ;;  %v1659_v24 = vld [vmem:[#allocation5 + $0x2a0] ss:$8 sps:$4 sm:$0xff]   ;;  %v1654_v25 = vld [vmem:[#allocation5 + $0x124] ss:$8 sps:$4 sm:$0xff]  }
  0x72   :  { %999 = vmatprep.mubr.bf16.mxu1 %v1566_v26  ;;  %v1662_v26 = vld [vmem:[#allocation5 + $0x2b4] ss:$8 sps:$4 sm:$0xff]  }
  0x78   :  { %800 = vmatmul.mubr.bf16.gmra.mrb[8].mxu0 %v1562_v27  ;;  %v1658_v27 = vld [vmem:[#allocation5 + $0x120] ss:$8 sps:$4 sm:$0xff]  }
  0x79   :  { %1000 = vmatmul.mubr.bf16.gmra.mrb[8].mxu1 %v1569_v28  ;;  %807 = vmatprep.mubr.bf16.mxu0 %v1564_v29  ;;  %v1665_v28 = vld [vmem:[#allocation5 + $0x2b0] ss:$8 sps:$4 sm:$0xff]   ;;  %v1660_v29 = vld [vmem:[#allocation5 + $0x134] ss:$8 sps:$4 sm:$0xff]  }
  0x7a   :  { %1007 = vmatprep.mubr.bf16.mxu1 %v1572_v30  ;;  %v1668_v30 = vld [vmem:[#allocation5 + $0x2c4] ss:$8 sps:$4 sm:$0xff]  }
  0x80   :  { %808 = vmatmul.mubr.bf16.gmra.mrb[12].mxu0 %v1568_v31  ;;  %v1664_v31 = vld [vmem:[#allocation5 + $0x130] ss:$8 sps:$4 sm:$0xff]  }
  0x81   :  { %1008 = vmatmul.mubr.bf16.gmra.mrb[12].mxu1 %v1575_v32  ;;  %815 = vmatprep.mubr.bf16.mxu0 %v1570_v33  ;;  %v1671_v32 = vld [vmem:[#allocation5 + $0x2c0] ss:$8 sps:$4 sm:$0xff]   ;;  %v1666_v33 = vld [vmem:[#allocation5 + $0x144] ss:$8 sps:$4 sm:$0xff]  }
  0x82   :  { %1015 = vmatprep.mubr.bf16.mxu1 %v1578_v34  ;;  %v1674_v34 = vld [vmem:[#allocation5 + $0x2d4] ss:$8 sps:$4 sm:$0xff]  }
  0x88   :  { %816 = vmatmul.mubr.bf16.gmra.mrb[16].mxu0 %v1574_v35  ;;  %v1670_v35 = vld [vmem:[#allocation5 + $0x140] ss:$8 sps:$4 sm:$0xff]  }
  0x89   :  { %1016 = vmatmul.mubr.bf16.gmra.mrb[16].mxu1 %v1581_v36  ;;  %823 = vmatprep.mubr.bf16.mxu0 %v1576_v37  ;;  %v1677_v36 = vld [vmem:[#allocation5 + $0x2d0] ss:$8 sps:$4 sm:$0xff]   ;;  %v1672_v37 = vld [vmem:[#allocation5 + $0x154] ss:$8 sps:$4 sm:$0xff]  }
  0x8a   :  { %1023 = vmatprep.mubr.bf16.mxu1 %v1584_v38  ;;  %v1680_v38 = vld [vmem:[#allocation5 + $0x2e4] ss:$8 sps:$4 sm:$0xff]  }
  0x90   :  { %824 = vmatmul.mubr.bf16.gmra.mrb[20].mxu0 %v1580_v39  ;;  %v1676_v39 = vld [vmem:[#allocation5 + $0x150] ss:$8 sps:$4 sm:$0xff]  }
  0x91   :  { %1024 = vmatmul.mubr.bf16.gmra.mrb[20].mxu1 %v1587_v40  ;;  %831 = vmatprep.mubr.bf16.mxu0 %v1582_v41  ;;  %v1683_v40 = vld [vmem:[#allocation5 + $0x2e0] ss:$8 sps:$4 sm:$0xff]   ;;  %v1678_v41 = vld [vmem:[#allocation5 + $0x164] ss:$8 sps:$4 sm:$0xff]  }
  0x92   :  { %1031 = vmatprep.mubr.bf16.mxu1 %v1590_v42  ;;  %v1686_v42 = vld [vmem:[#allocation5 + $0x2f4] ss:$8 sps:$4 sm:$0xff]  }
  0x98   :  { %832 = vmatmul.mubr.bf16.gmra.mrb[24].mxu0 %v1586_v43  ;;  %v1682_v43 = vld [vmem:[#allocation5 + $0x160] ss:$8 sps:$4 sm:$0xff]  }
  0x99   :  { %1032 = vmatmul.mubr.bf16.gmra.mrb[24].mxu1 %v1593_v44  ;;  %839 = vmatprep.mubr.bf16.mxu0 %v1588_v45  ;;  %v1689_v44 = vld [vmem:[#allocation5 + $0x2f0] ss:$8 sps:$4 sm:$0xff]   ;;  %v1684_v45 = vld [vmem:[#allocation5 + $0x174] ss:$8 sps:$4 sm:$0xff]  }
  0x9a   :  { %1039 = vmatprep.mubr.bf16.mxu1 %v1596_v46  ;;  %v1688_v46 = vld [vmem:[#allocation5 + $0x170] ss:$8 sps:$4 sm:$0xff]  }
  0xa0   :  { %840 = vmatmul.mubr.bf16.gmra.mrb[28].mxu0 %v1592_v47  ;;  %v1690_v47 = vld [vmem:[#allocation5 + $0x184] ss:$8 sps:$4 sm:$0xff]  }
  0xa1   :  { %1040 = vmatmul.mubr.bf16.gmra.mrb[28].mxu1 %v1599_v48  ;;  %847 = vmatprep.mubr.bf16.mxu0 %v1594_v49  ;;  %v1692_v48 = vld [vmem:[#allocation5 + $0x180] ss:$8 sps:$4 sm:$0xff]  }
  0xa2   :  { %1047 = vmatprep.mubr.bf16.mxu1 %v1602_v50 }
  0xa8   :  { %848 = vmatmul.mubr.bf16.gmra.mrb[32].mxu0 %v1598_v51 }
  0xa9   :  { %1048 = vmatmul.mubr.bf16.gmra.mrb[32].mxu1 %v1605_v52  ;;  %855 = vmatprep.mubr.bf16.mxu0 %v1600_v53 }
  0xaa   :  { %1055 = vmatprep.mubr.bf16.mxu1 %v1608_v54 }
  0xb0   :  { %856 = vmatmul.mubr.bf16.gmra.mrb[36].mxu0 %v1604_v55 }
  0xb1   :  { %1056 = vmatmul.mubr.bf16.gmra.mrb[36].mxu1 %v1611_v56  ;;  %863 = vmatprep.mubr.bf16.mxu0 %v1606_v57 }
  0xb2   :  { %1063 = vmatprep.mubr.bf16.mxu1 %v1614_v58 }
  0xb8   :  { %864 = vmatmul.mubr.bf16.gmra.mrb[40].mxu0 %v1610_v59 }
  0xb9   :  { %1064 = vmatmul.mubr.bf16.gmra.mrb[40].mxu1 %v1617_v60  ;;  %871 = vmatprep.mubr.bf16.mxu0 %v1612_v61 }
  0xba   :  { %1071 = vmatprep.mubr.bf16.mxu1 %v1620_v62 }
  0xc0   :  { %872 = vmatmul.mubr.bf16.gmra.mrb[44].mxu0 %v1616_v63 }
  0xc1   :  { %1072 = vmatmul.mubr.bf16.gmra.mrb[44].mxu1 %v1623_v0  ;;  %879 = vmatprep.mubr.bf16.mxu0 %v1618_v1 }
  0xc2   :  { %1079 = vmatprep.mubr.bf16.mxu1 %v1626_v2 }
  0xc8   :  { %880 = vmatmul.mubr.bf16.gmra.mrb[48].mxu0 %v1622_v3 }
  0xc9   :  { %1080 = vmatmul.mubr.bf16.gmra.mrb[48].mxu1 %v1629_v4  ;;  %887 = vmatprep.mubr.bf16.mxu0 %v1624_v5 }
  0xca   :  { %1087 = vmatprep.mubr.bf16.mxu1 %v1632_v6 }
  0xd0   :  { %888 = vmatmul.mubr.bf16.gmra.mrb[52].mxu0 %v1628_v7 }
  0xd1   :  { %1088 = vmatmul.mubr.bf16.gmra.mrb[52].mxu1 %v1635_v8  ;;  %895 = vmatprep.mubr.bf16.mxu0 %v1630_v9 }
  0xd2   :  { %1095 = vmatprep.mubr.bf16.mxu1 %v1638_v10 }
  0xd8   :  { %896 = vmatmul.mubr.bf16.gmra.mrb[56].mxu0 %v1634_v11 }
  0xd9   :  { %1096 = vmatmul.mubr.bf16.gmra.mrb[56].mxu1 %v1641_v12  ;;  %903 = vmatprep.mubr.bf16.mxu0 %v1636_v13 }
  0xda   :  { %1103 = vmatprep.mubr.bf16.mxu1 %v1644_v14 }
  0xe0   :  { %904 = vmatmul.mubr.bf16.gmra.mrb[60].mxu0 %v1640_v15 }
  0xe1   :  { %1104 = vmatmul.mubr.bf16.gmra.mrb[60].mxu1 %v1647_v16  ;;  %911 = vmatprep.mubr.bf16.mxu0 %v1642_v17 }
  0xe2   :  { %1111 = vmatprep.mubr.bf16.mxu1 %v1650_v18 }
  0xe8   :  { %912 = vmatmul.mubr.bf16.gmra.mrb[64].mxu0 %v1646_v19 }
  0xe9   :  { %1112 = vmatmul.mubr.bf16.gmra.mrb[64].mxu1 %v1653_v20  ;;  %919 = vmatprep.mubr.bf16.mxu0 %v1648_v21 }
  0xea   :  { %1119 = vmatprep.mubr.bf16.mxu1 %v1656_v22 }
  0xf0   :  { %920 = vmatmul.mubr.bf16.gmra.mrb[68].mxu0 %v1652_v23 }
  0xf1   :  { %1120 = vmatmul.mubr.bf16.gmra.mrb[68].mxu1 %v1659_v24  ;;  %927 = vmatprep.mubr.bf16.mxu0 %v1654_v25 }
  0xf2   :  { %1127 = vmatprep.mubr.bf16.mxu1 %v1662_v26 }
  0xf8   :  { %928 = vmatmul.mubr.bf16.gmra.mrb[72].mxu0 %v1658_v27 }
  0xf9   :  { %1128 = vmatmul.mubr.bf16.gmra.mrb[72].mxu1 %v1665_v28  ;;  %935 = vmatprep.mubr.bf16.mxu0 %v1660_v29 }
  0xfa   :  { %1135 = vmatprep.mubr.bf16.mxu1 %v1668_v30 }
 0x100   :  { %936 = vmatmul.mubr.bf16.gmra.mrb[76].mxu0 %v1664_v31 }
 0x101   :  { %1136 = vmatmul.mubr.bf16.gmra.mrb[76].mxu1 %v1671_v32  ;;  %943 = vmatprep.mubr.bf16.mxu0 %v1666_v33 }
 0x102   :  { %1143 = vmatprep.mubr.bf16.mxu1 %v1674_v34 }
 0x108   :  { %944 = vmatmul.mubr.bf16.gmra.mrb[80].mxu0 %v1670_v35 }
 0x109   :  { %1144 = vmatmul.mubr.bf16.gmra.mrb[80].mxu1 %v1677_v36  ;;  %951 = vmatprep.mubr.bf16.mxu0 %v1672_v37 }
 0x10a   :  { %1151 = vmatprep.mubr.bf16.mxu1 %v1680_v38 }
 0x110   :  { %952 = vmatmul.mubr.bf16.gmra.mrb[84].mxu0 %v1676_v39 }
 0x111   :  { %1152 = vmatmul.mubr.bf16.gmra.mrb[84].mxu1 %v1683_v40  ;;  %959 = vmatprep.mubr.bf16.mxu0 %v1678_v41 }
 0x112   :  { %1159 = vmatprep.mubr.bf16.mxu1 %v1686_v42 }
 0x118   :  { %960 = vmatmul.mubr.bf16.gmra.mrb[88].mxu0 %v1682_v43 }
 0x119   :  { %1160 = vmatmul.mubr.bf16.gmra.mrb[88].mxu1 %v1689_v44  ;;  %967 = vmatprep.mubr.bf16.mxu0 %v1684_v45 }
 0x120   :  { %968 = vmatmul.mubr.bf16.gmra.mrb[92].mxu0 %v1688_v46 }
 0x121   :  { %975 = vmatprep.mubr.bf16.mxu0 %v1690_v47 }
 0x128   :  { %976 = vmatmul.mubr.bf16.gmra.mrb[96].mxu0 %v1692_v48 }
 0x13b   :  { %v785_v49 = vpop.f32.mrb[0].mxu0 }
 0x13c   :  { %v985_v50 = vpop.f32.mrb[0].mxu1  ;;  %v787_v51 = vpop.f32.mrb[1].mxu0 }
 0x13d   :  { %v987_v52 = vpop.f32.mrb[1].mxu1  ;;  %v788_v53 = vpop.f32.mrb[2].mxu0 }
 0x13e   :  { %v988_v54 = vpop.f32.mrb[2].mxu1  ;;  %v790_v55 = vpop.f32.mrb[3].mxu0 }
 0x13f   :  { %v990_v56 = vpop.f32.mrb[3].mxu1 }
 0x143   :  { %v793_v57 = vpop.f32.mrb[4].mxu0 }
 0x144   :  { %v993_v58 = vpop.f32.mrb[4].mxu1  ;;  %v1170_v59 = vmax.f32 %v793_v57, %v985_v50  ;;  %v795_v60 = vpop.f32.mrb[5].mxu0 }
 0x145   :  { %v995_v61 = vpop.f32.mrb[5].mxu1  ;;  %v796_v62 = vpop.f32.mrb[6].mxu0 }
 0x146   :  { %v996_v63 = vpop.f32.mrb[6].mxu1  ;;  %v1171_v0 = vmax.f32 %v796_v62, %v988_v54  ;;  %v798_v1 = vpop.f32.mrb[7].mxu0 }
 0x147   :  { %v998_v2 = vpop.f32.mrb[7].mxu1 }
 0x148   :  { %v1219_v3 = vmax.f32 %v1171_v0, %v785_v49 }
 0x14b   :  { %v801_v4 = vpop.f32.mrb[8].mxu0 }
 0x14c   :  { %v1001_v5 = vpop.f32.mrb[8].mxu1  ;;  %v1172_v6 = vmax.f32 %v801_v4, %v993_v58  ;;  %v803_v7 = vpop.f32.mrb[9].mxu0 }
 0x14d   :  { %v1003_v8 = vpop.f32.mrb[9].mxu1  ;;  %v804_v9 = vpop.f32.mrb[10].mxu0 }
 0x14e   :  { %v1004_v10 = vpop.f32.mrb[10].mxu1  ;;  %v1220_v11 = vmax.f32 %v1172_v6, %v788_v53  ;;  %v1173_v12 = vmax.f32 %v804_v9, %v996_v63  ;;  %v806_v13 = vpop.f32.mrb[11].mxu0 }
 0x14f   :  { %v1006_v14 = vpop.f32.mrb[11].mxu1 }
 0x150   :  { %v1218_v15 = vmax.f32 %v1170_v59, %v1173_v12 }
 0x153   :  { %v809_v16 = vpop.f32.mrb[12].mxu0 }
 0x154   :  { %v1009_v17 = vpop.f32.mrb[12].mxu1  ;;  %v1174_v18 = vmax.f32 %v809_v16, %v1001_v5  ;;  %v811_v19 = vpop.f32.mrb[13].mxu0 }
 0x155   :  { %v1011_v20 = vpop.f32.mrb[13].mxu1  ;;  %v812_v21 = vpop.f32.mrb[14].mxu0 }
 0x156   :  { %v1012_v22 = vpop.f32.mrb[14].mxu1  ;;  %v1222_v23 = vmax.f32 %v1174_v18, %v1219_v3  ;;  %v1175_v24 = vmax.f32 %v812_v21, %v1004_v10  ;;  %v814_v25 = vpop.f32.mrb[15].mxu0 }
 0x157   :  { %v1014_v26 = vpop.f32.mrb[15].mxu1 }
 0x158   :  { %v1223_v27 = vmax.f32 %v1175_v24, %v1220_v11 }
 0x15b   :  { %v817_v28 = vpop.f32.mrb[16].mxu0 }
 0x15c   :  { %v1017_v29 = vpop.f32.mrb[16].mxu1  ;;  %v1176_v30 = vmax.f32 %v817_v28, %v1009_v17  ;;  %v819_v31 = vpop.f32.mrb[17].mxu0 }
 0x15d   :  { %v1019_v32 = vpop.f32.mrb[17].mxu1  ;;  %v820_v33 = vpop.f32.mrb[18].mxu0 }
 0x15e   :  { %v1020_v34 = vpop.f32.mrb[18].mxu1  ;;  %v1221_v35 = vmax.f32 %v1176_v30, %v1218_v15  ;;  %v1177_v36 = vmax.f32 %v820_v33, %v1012_v22  ;;  %v822_v37 = vpop.f32.mrb[19].mxu0 }
 0x15f   :  { %v1022_v38 = vpop.f32.mrb[19].mxu1  ;;  %v1265_v37 = vld [vmem:[%s1899_s3] sm:$0xff] }
 0x160   :  { %v1225_v39 = vmax.f32 %v1177_v36, %v1222_v23  ;;  %v1781_v23 = vmov 0.0   ;;  %1269 = vperm.xlu0 %1532, %v1265_v37  }
 0x161   :  { %1482 = vmatprep.subr.bf16.mxu1 %v1781_v23  ;;  %1486 = vmatprep.mubr.msk.bf16.mxu1 %vm1782_vm0, %v1781_v23 }
 0x163   :  { %v825_v40 = vpop.f32.mrb[20].mxu0 }
 0x164   :  { %v1025_v41 = vpop.f32.mrb[20].mxu1  ;;  %v1178_v42 = vmax.f32 %v825_v40, %v1017_v29  ;;  %v827_v43 = vpop.f32.mrb[21].mxu0  ;;  %v1266_v40 = vld [vmem:[%s1899_s3 + $0x8] sm:$0xff] }
 0x165   :  { %v1027_v44 = vpop.f32.mrb[21].mxu1  ;;  %v828_v45 = vpop.f32.mrb[22].mxu0  ;;  %1274 = vperm.xlu0 %1532, %v1266_v40  }
 0x166   :  { %v1028_v46 = vpop.f32.mrb[22].mxu1  ;;  %v1226_v47 = vmax.f32 %v1178_v42, %v1223_v27  ;;  %v1179_v48 = vmax.f32 %v828_v45, %v1020_v34  ;;  %v830_v49 = vpop.f32.mrb[23].mxu0 }
 0x167   :  { %v1030_v50 = vpop.f32.mrb[23].mxu1 }
 0x168   :  { %v1224_v51 = vmax.f32 %v1179_v48, %v1221_v35 }
 0x16b   :  { %v833_v52 = vpop.f32.mrb[24].mxu0 }
 0x16c   :  { %v1033_v53 = vpop.f32.mrb[24].mxu1  ;;  %v1180_v54 = vmax.f32 %v833_v52, %v1025_v41  ;;  %v835_v55 = vpop.f32.mrb[25].mxu0 }
 0x16d   :  { %v1035_v56 = vpop.f32.mrb[25].mxu1  ;;  %v836_v57 = vpop.f32.mrb[26].mxu0 }
 0x16e   :  { %v1036_v58 = vpop.f32.mrb[26].mxu1  ;;  %v1228_v59 = vmax.f32 %v1180_v54, %v1225_v39  ;;  %v1181_v60 = vmax.f32 %v836_v57, %v1028_v46  ;;  %v838_v61 = vpop.f32.mrb[27].mxu0 }
 0x16f   :  { %v1038_v62 = vpop.f32.mrb[27].mxu1 }
 0x170   :  { %v1229_v63 = vmax.f32 %v1181_v60, %v1226_v47 }
 0x173   :  { %v841_v0 = vpop.f32.mrb[28].mxu0 }
 0x174   :  { %v1041_v1 = vpop.f32.mrb[28].mxu1  ;;  %v1182_v2 = vmax.f32 %v841_v0, %v1033_v53  ;;  %v843_v3 = vpop.f32.mrb[29].mxu0 }
 0x175   :  { %v1043_v4 = vpop.f32.mrb[29].mxu1  ;;  %v844_v5 = vpop.f32.mrb[30].mxu0 }
 0x176   :  { %v1044_v6 = vpop.f32.mrb[30].mxu1  ;;  %v1227_v7 = vmax.f32 %v1182_v2, %v1224_v51  ;;  %v1183_v8 = vmax.f32 %v844_v5, %v1036_v58  ;;  %v846_v9 = vpop.f32.mrb[31].mxu0 }
 0x177   :  { %v1046_v10 = vpop.f32.mrb[31].mxu1 }
 0x178   :  { %v1231_v11 = vmax.f32 %v1183_v8, %v1228_v59 }
 0x17b   :  { %v849_v12 = vpop.f32.mrb[32].mxu0 }
 0x17c   :  { %v1049_v13 = vpop.f32.mrb[32].mxu1  ;;  %v1184_v14 = vmax.f32 %v849_v12, %v1041_v1  ;;  %v851_v15 = vpop.f32.mrb[33].mxu0 }
 0x17d   :  { %v1051_v16 = vpop.f32.mrb[33].mxu1  ;;  %v852_v17 = vpop.f32.mrb[34].mxu0 }
 0x17e   :  { %v1052_v18 = vpop.f32.mrb[34].mxu1  ;;  %v1232_v19 = vmax.f32 %v1184_v14, %v1229_v63  ;;  %v1185_v20 = vmax.f32 %v852_v17, %v1044_v6  ;;  %v854_v21 = vpop.f32.mrb[35].mxu0 }
 0x17f   :  { %v1054_v22 = vpop.f32.mrb[35].mxu1 }
 0x180   :  { %v1230_v24 = vmax.f32 %v1185_v20, %v1227_v7 }
 0x183   :  { %v857_v25 = vpop.f32.mrb[36].mxu0 }
 0x184   :  { %v1057_v26 = vpop.f32.mrb[36].mxu1  ;;  %v1186_v27 = vmax.f32 %v857_v25, %v1049_v13  ;;  %v859_v28 = vpop.f32.mrb[37].mxu0 }
 0x185   :  { %v1059_v29 = vpop.f32.mrb[37].mxu1  ;;  %v860_v30 = vpop.f32.mrb[38].mxu0 }
 0x186   :  { %v1060_v31 = vpop.f32.mrb[38].mxu1  ;;  %v1243_v32 = vmax.f32 %v1186_v27, %v1231_v11  ;;  %v1187_v33 = vmax.f32 %v860_v30, %v1052_v18  ;;  %v862_v34 = vpop.f32.mrb[39].mxu0 }
 0x187   :  { %v1062_v35 = vpop.f32.mrb[39].mxu1 }
 0x188   :  { %v1244_v36 = vmax.f32 %v1187_v33, %v1232_v19 }
 0x18b   :  { %v865_v38 = vpop.f32.mrb[40].mxu0 }
 0x18c   :  { %v1065_v39 = vpop.f32.mrb[40].mxu1  ;;  %v1188_v41 = vmax.f32 %v865_v38, %v1057_v26  ;;  %v867_v42 = vpop.f32.mrb[41].mxu0 }
 0x18d   :  { %v1067_v43 = vpop.f32.mrb[41].mxu1  ;;  %v868_v44 = vpop.f32.mrb[42].mxu0 }
 0x18e   :  { %v1068_v45 = vpop.f32.mrb[42].mxu1  ;;  %v1242_v46 = vmax.f32 %v1188_v41, %v1230_v24  ;;  %v1189_v47 = vmax.f32 %v868_v44, %v1060_v31  ;;  %v870_v48 = vpop.f32.mrb[43].mxu0 }
 0x18f   :  { %v1070_v49 = vpop.f32.mrb[43].mxu1 }
 0x190   :  { %v1234_v50 = vmax.f32 %v1189_v47, %v1243_v32 }
 0x193   :  { %v873_v51 = vpop.f32.mrb[44].mxu0 }
 0x194   :  { %v1073_v52 = vpop.f32.mrb[44].mxu1  ;;  %v1190_v53 = vmax.f32 %v873_v51, %v1065_v39  ;;  %v875_v54 = vpop.f32.mrb[45].mxu0 }
 0x195   :  { %v1075_v55 = vpop.f32.mrb[45].mxu1  ;;  %v876_v56 = vpop.f32.mrb[46].mxu0 }
 0x196   :  { %v1076_v57 = vpop.f32.mrb[46].mxu1  ;;  %v1235_v58 = vmax.f32 %v1190_v53, %v1244_v36  ;;  %v1191_v59 = vmax.f32 %v876_v56, %v1068_v45  ;;  %v878_v60 = vpop.f32.mrb[47].mxu0 }
 0x197   :  { %v1078_v61 = vpop.f32.mrb[47].mxu1 }
 0x198   :  { %v1233_v62 = vmax.f32 %v1191_v59, %v1242_v46 }
 0x19b   :  { %v881_v63 = vpop.f32.mrb[48].mxu0 }
 0x19c   :  { %v1081_v0 = vpop.f32.mrb[48].mxu1  ;;  %v1192_v1 = vmax.f32 %v881_v63, %v1073_v52  ;;  %v883_v2 = vpop.f32.mrb[49].mxu0 }
 0x19d   :  { %v1083_v3 = vpop.f32.mrb[49].mxu1  ;;  %v884_v4 = vpop.f32.mrb[50].mxu0 }
 0x19e   :  { %v1084_v5 = vpop.f32.mrb[50].mxu1  ;;  %v1246_v6 = vmax.f32 %v1192_v1, %v1234_v50  ;;  %v1193_v7 = vmax.f32 %v884_v4, %v1076_v57  ;;  %v886_v8 = vpop.f32.mrb[51].mxu0 }
 0x19f   :  { %v1086_v9 = vpop.f32.mrb[51].mxu1 }
 0x1a0   :  { %v1247_v10 = vmax.f32 %v1193_v7, %v1235_v58 }
 0x1a3   :  { %v889_v11 = vpop.f32.mrb[52].mxu0 }
 0x1a4   :  { %v1089_v12 = vpop.f32.mrb[52].mxu1  ;;  %v1194_v13 = vmax.f32 %v889_v11, %v1081_v0  ;;  %v891_v14 = vpop.f32.mrb[53].mxu0 }
 0x1a5   :  { %v1091_v15 = vpop.f32.mrb[53].mxu1  ;;  %v892_v16 = vpop.f32.mrb[54].mxu0 }
 0x1a6   :  { %v1092_v17 = vpop.f32.mrb[54].mxu1  ;;  %v1245_v18 = vmax.f32 %v1194_v13, %v1233_v62  ;;  %v1195_v19 = vmax.f32 %v892_v16, %v1084_v5  ;;  %v894_v20 = vpop.f32.mrb[55].mxu0 }
 0x1a7   :  { %v1094_v21 = vpop.f32.mrb[55].mxu1 }
 0x1a8   :  { %v1237_v22 = vmax.f32 %v1195_v19, %v1246_v6 }
 0x1ab   :  { %v897_v24 = vpop.f32.mrb[56].mxu0 }
 0x1ac   :  { %v1097_v25 = vpop.f32.mrb[56].mxu1  ;;  %v1196_v26 = vmax.f32 %v897_v24, %v1089_v12  ;;  %v899_v27 = vpop.f32.mrb[57].mxu0 }
 0x1ad   :  { %v1099_v28 = vpop.f32.mrb[57].mxu1  ;;  %v900_v29 = vpop.f32.mrb[58].mxu0 }
 0x1ae   :  { %v1100_v30 = vpop.f32.mrb[58].mxu1  ;;  %v1238_v31 = vmax.f32 %v1196_v26, %v1247_v10  ;;  %v1197_v32 = vmax.f32 %v900_v29, %v1092_v17  ;;  %v902_v33 = vpop.f32.mrb[59].mxu0 }
 0x1af   :  { %v1102_v34 = vpop.f32.mrb[59].mxu1 }
 0x1b0   :  { %v1236_v35 = vmax.f32 %v1197_v32, %v1245_v18 }
 0x1b3   :  { %v905_v36 = vpop.f32.mrb[60].mxu0 }
 0x1b4   :  { %v1105_v37 = vpop.f32.mrb[60].mxu1  ;;  %v1198_v38 = vmax.f32 %v905_v36, %v1097_v25  ;;  %v907_v39 = vpop.f32.mrb[61].mxu0 }
 0x1b5   :  { %v1107_v40 = vpop.f32.mrb[61].mxu1  ;;  %v908_v41 = vpop.f32.mrb[62].mxu0 }
 0x1b6   :  { %v1108_v42 = vpop.f32.mrb[62].mxu1  ;;  %v1249_v43 = vmax.f32 %v1198_v38, %v1237_v22  ;;  %v1199_v44 = vmax.f32 %v908_v41, %v1100_v30  ;;  %v910_v45 = vpop.f32.mrb[63].mxu0 }
 0x1b7   :  { %v1110_v46 = vpop.f32.mrb[63].mxu1 }
 0x1b8   :  { %v1250_v47 = vmax.f32 %v1199_v44, %v1238_v31 }
 0x1bb   :  { %v913_v48 = vpop.f32.mrb[64].mxu0 }
 0x1bc   :  { %v1113_v49 = vpop.f32.mrb[64].mxu1  ;;  %v1200_v50 = vmax.f32 %v913_v48, %v1105_v37  ;;  %v915_v51 = vpop.f32.mrb[65].mxu0 }
 0x1bd   :  { %v1115_v52 = vpop.f32.mrb[65].mxu1  ;;  %v916_v53 = vpop.f32.mrb[66].mxu0 }
 0x1be   :  { %v1116_v54 = vpop.f32.mrb[66].mxu1  ;;  %v1248_v55 = vmax.f32 %v1200_v50, %v1236_v35  ;;  %v1201_v56 = vmax.f32 %v916_v53, %v1108_v42  ;;  %v918_v57 = vpop.f32.mrb[67].mxu0 }
 0x1bf   :  { %v1118_v58 = vpop.f32.mrb[67].mxu1 }
 0x1c0   :  { %v1255_v59 = vmax.f32 %v1201_v56, %v1249_v43 }
 0x1c3   :  { %v921_v60 = vpop.f32.mrb[68].mxu0 }
 0x1c4   :  { %v1121_v61 = vpop.f32.mrb[68].mxu1  ;;  %v1202_v62 = vmax.f32 %v921_v60, %v1113_v49  ;;  %v923_v63 = vpop.f32.mrb[69].mxu0 }
 0x1c5   :  { %v1123_v0 = vpop.f32.mrb[69].mxu1  ;;  %v924_v1 = vpop.f32.mrb[70].mxu0 }
 0x1c6   :  { %v1124_v2 = vpop.f32.mrb[70].mxu1  ;;  %v1256_v3 = vmax.f32 %v1202_v62, %v1250_v47  ;;  %v1203_v4 = vmax.f32 %v924_v1, %v1116_v54  ;;  %v926_v5 = vpop.f32.mrb[71].mxu0 }
 0x1c7   :  { %v1126_v6 = vpop.f32.mrb[71].mxu1 }
 0x1c8   :  { %v1254_v7 = vmax.f32 %v1203_v4, %v1248_v55 }
 0x1cb   :  { %v929_v8 = vpop.f32.mrb[72].mxu0 }
 0x1cc   :  { %v1129_v9 = vpop.f32.mrb[72].mxu1  ;;  %v1204_v10 = vmax.f32 %v929_v8, %v1121_v61  ;;  %v931_v11 = vpop.f32.mrb[73].mxu0 }
 0x1cd   :  { %v1131_v12 = vpop.f32.mrb[73].mxu1  ;;  %v932_v13 = vpop.f32.mrb[74].mxu0 }
 0x1ce   :  { %v1132_v14 = vpop.f32.mrb[74].mxu1  ;;  %v1168_v15 = vmax.f32 %v1204_v10, %v1255_v59  ;;  %v1205_v16 = vmax.f32 %v932_v13, %v1124_v2  ;;  %v934_v17 = vpop.f32.mrb[75].mxu0 }
 0x1cf   :  { %v1134_v18 = vpop.f32.mrb[75].mxu1 }
 0x1d0   :  { %v1169_v19 = vmax.f32 %v1205_v16, %v1256_v3 }
 0x1d3   :  { %v937_v20 = vpop.f32.mrb[76].mxu0 }
 0x1d4   :  { %v1137_v21 = vpop.f32.mrb[76].mxu1  ;;  %v1206_v22 = vmax.f32 %v937_v20, %v1129_v9  ;;  %v939_v24 = vpop.f32.mrb[77].mxu0 }
 0x1d5   :  { %v1139_v25 = vpop.f32.mrb[77].mxu1  ;;  %v940_v26 = vpop.f32.mrb[78].mxu0 }
 0x1d6   :  { %v1140_v27 = vpop.f32.mrb[78].mxu1  ;;  %v1239_v28 = vmax.f32 %v1206_v22, %v1254_v7  ;;  %v1207_v29 = vmax.f32 %v940_v26, %v1132_v14  ;;  %v942_v30 = vpop.f32.mrb[79].mxu0  ;;  %v1693_v22 = vld [vmem:[%s1898_s2] sm:$0xff]   ;;  %s1783_s2 = smov [#allocation7]  }
 0x1d7   :  { %v1142_v31 = vpop.f32.mrb[79].mxu1  ;;  %s1350_s20 = sshll.u32 %s1783_s2, 4  ;;  %s1351_s20 = int_to_ptr.vmem [resolvable:$true] %s1350_s20 }
 0x1d8   :  { %v1216_v32 = vmax.f32 %v1168_v15, %v1207_v29  ;;  %s1746_s21 = scalar_lea.vmem %s1351_s20, 256  ;;  %p1751_p3 = scmp.lt.s32.totalorder %s1351_s20, %s1351_s20 }
 0x1d9   :  { %p1747_p2 = scmp.ne.s32.totalorder %s1351_s20, %s1746_s21  ;;  %p1752_p4 = scmp.lt.s32.totalorder %s1746_s21, %s1746_s21 }
 0x1db   :  { %v945_v33 = vpop.f32.mrb[80].mxu0  ;;  %p1753_p5 = por %p1752_p4, %p1751_p3 }
 0x1dc   :  { %v1145_v34 = vpop.f32.mrb[80].mxu1  ;;  %v1208_v35 = vmax.f32 %v945_v33, %v1137_v21  ;;  %v947_v36 = vpop.f32.mrb[81].mxu0 }
 0x1dd   :  { %v1147_v37 = vpop.f32.mrb[81].mxu1  ;;  %v948_v38 = vpop.f32.mrb[82].mxu0  ;;  %p1754_p6 = pnand %p1753_p5, %p1747_p2 }
 0x1de   :  { %v1148_v39 = vpop.f32.mrb[82].mxu1  ;;  %v1217_v40 = vmax.f32 %v1169_v19, %v1208_v35  ;;  %v1209_v41 = vmax.f32 %v948_v38, %v1140_v27  ;;  %v950_v42 = vpop.f32.mrb[83].mxu0 }
 0x1df   :  { %v1150_v43 = vpop.f32.mrb[83].mxu1  ;;  %v1270_v24 = vpop.permute.xlu0 %1269 }
 0x1e0   :  { %v1251_v44 = vmax.f32 %v1209_v41, %v1239_v28 }
 0x1e3   :  { %v953_v45 = vpop.f32.mrb[84].mxu0 }
 0x1e4   :  { %v1153_v46 = vpop.f32.mrb[84].mxu1  ;;  %v1210_v47 = vmax.f32 %v953_v45, %v1145_v34  ;;  %v955_v48 = vpop.f32.mrb[85].mxu0 }
 0x1e5   :  { %v1155_v49 = vpop.f32.mrb[85].mxu1  ;;  %v956_v50 = vpop.f32.mrb[86].mxu0 }
 0x1e6   :  { %v1156_v51 = vpop.f32.mrb[86].mxu1  ;;  %v1240_v52 = vmax.f32 %v1216_v32, %v1210_v47  ;;  %v1211_v53 = vmax.f32 %v956_v50, %v1148_v39  ;;  %v958_v54 = vpop.f32.mrb[87].mxu0 }
 0x1e7   :  { %v1158_v55 = vpop.f32.mrb[87].mxu1  ;;  %v1275_v28 = vpop.permute.xlu0 %1274 }
 0x1e8   :  { %v1241_v56 = vmax.f32 %v1217_v40, %v1211_v53 }
 0x1eb   :  { %v961_v57 = vpop.f32.mrb[88].mxu0 }
 0x1ec   :  { %v1161_v58 = vpop.f32.mrb[88].mxu1  ;;  %v1212_v59 = vmax.f32 %v961_v57, %v1153_v46  ;;  %v963_v60 = vpop.f32.mrb[89].mxu0 }
 0x1ed   :  { %v1163_v61 = vpop.f32.mrb[89].mxu1  ;;  %v964_v62 = vpop.f32.mrb[90].mxu0 }
 0x1ee   :  { %v1164_v63 = vpop.f32.mrb[90].mxu1  ;;  %v1257_v0 = vmax.f32 %v1212_v59, %v1251_v44  ;;  %v1213_v1 = vmax.f32 %v964_v62, %v1156_v51  ;;  %v966_v2 = vpop.f32.mrb[91].mxu0 }
 0x1ef   :  { %v1166_v3 = vpop.f32.mrb[91].mxu1 }
 0x1f0   :  { %v1252_v4 = vmax.f32 %v1240_v52, %v1213_v1 }
 0x1f3   :  { %v969_v5 = vpop.f32.mrb[92].mxu0 }
 0x1f4   :  { %v1214_v6 = vmax.f32 %v969_v5, %v1161_v58  ;;  %v971_v7 = vpop.f32.mrb[93].mxu0 }
 0x1f5   :  { %v972_v8 = vpop.f32.mrb[94].mxu0 }
 0x1f6   :  { %v1253_v9 = vmax.f32 %v1241_v56, %v1214_v6  ;;  %v1215_v10 = vmax.f32 %v972_v8, %v1164_v63  ;;  %v974_v11 = vpop.f32.mrb[95].mxu0 }
 0x1f8   :  { %v1260_v12 = vmax.f32 %v1215_v10, %v1257_v0 }
 0x1fa   :  { %v1262_v20 = vpack.c.bf16 %v1260_v12, %v1260_v12 }
 0x1fb   :  { %v977_v13 = vpop.f32.mrb[96].mxu0 }
 0x1fc   :  { %v1258_v14 = vmax.f32 %v1252_v4, %v977_v13  ;;  %v979_v15 = vpop.f32.mrb[97].mxu0  ;;  %v1288_v21 = vsel %vm1286_vm1, %v1262_v20, 0 }
 0x1fd   :  { %v980_v16 = vpop.f32.mrb[98].mxu0 }
 0x1fe   :  { %v1259_v17 = vmax.f32 %v1253_v9, %v980_v16  ;;  %v982_v18 = vpop.f32.mrb[99].mxu0 }
 0x200   :  { %v1261_v19 = vpack.c.bf16 %v1259_v17, %v1258_v14 }
 0x202   :  { %1483 = vmatpush3.bf16.msra.mxu1 %v1261_v19 }
 0x203   :  { %1484 = vmatprep.subr.bf16.mxu1 %v1781_v23 }
 0x206   :  { %1485 = vmatpush3.bf16.msra.mxu1 %v1288_v21 }
 0x209   :  { %1487 = vmatmul.mubr.msk.bf16.vlgmr.msra.gmra.mrb[92].mxu1 %vm1282_vm2, %v1693_v22 }
 0x2dc   :  { %v1324_v25 = vpop.f32.mrb[92].mxu1 }
 0x2dd   :  { %v1325_v26 = vadd.f32 %v1324_v25, %v1270_v24  ;;  %v1488_v27 = vpop.f32.mrb[93].mxu1 }
 0x2de   :  { %v1327_v29 = vpop.f32.mrb[94].mxu1 }
 0x2df   :  { %v1477_v30 = vmul.f32 -1.442695, %v1325_v26  ;;  %v1328_v31 = vadd.f32 %v1327_v29, %v1275_v28  ;;  %v1489_v32 = vpop.f32.mrb[95].mxu1 }
 0x2e1   :  { %1694 = vpow2.f32 %v1477_v30  ;;  %v1478_v33 = vmul.f32 -1.442695, %v1328_v31 }
 0x2e3   :  { %1696 = vpow2.f32 %v1478_v33 }
 0x2eb   :  { %v1695_v23 = vpop.eup %1694 }
 0x2ec   :  { %v1337_v34 = vadd.f32 1.0, %v1695_v23 }
 0x2ed   :  { %v1697_v35 = vpop.eup %1696 }
 0x2ee   :  { %1698 = vrcp.f32 %v1337_v34  ;;  %v1338_v36 = vadd.f32 1.0, %v1697_v35 }
 0x2f0   :  { %1700 = vrcp.f32 %v1338_v36 }
 0x2f8   :  { %v1699_v37 = vpop.eup %1698 }
 0x2f9   :  { %1343 = vst [vmem:[#allocation7] sm:$0xff] %v1699_v37 }
 0x2fa   :  { %v1701_v38 = vpop.eup %1700 }
 0x2fb   :  { %1344 = vst [vmem:[#allocation7 + $0x8] sm:$0xff] %v1701_v38 }
 0x2fc   :  { %1757 = shalt.err (!%p1754_p6)
}
 0x2fd   :  { %s1758_s24 = scalar_lea.hbm %s1900_s4, 256 }
 0x2fe   :  { %p1759_p7 = scmp.ne.s32.totalorder %s1900_s4, %s1758_s24  ;;  %p1762_p8 = scmp.lt.u32.totalorder %s1758_s24, %s1900_s4 }
 0x300   :  { %p1764_p9 = pnand %p1762_p8, %p1759_p7 }
 0x302   :  { %1767 = shalt.err (!%p1764_p9)
}
 0x303   :  { %1356 = dma.vmem_to_hbm [thread:$0]  %s1351_s20, 256, %s1900_s4, [#allocation4], %s1778_s0, %s1778_s0, %s1779_s13  }
 0x304   :  { %1772 = dma.done.wait [#allocation4], 256  }
 0x305   :  { %1773 = vsyncadd [#allocation4], 4294967040 }
 0x306   :  { %1360 = vsyncpa [#allocation3], 1 }
 0x307   :  { %1361 = vsyncpa [#allocation6], 1 }
 0x308   :  { %1362 = vsyncpa [#allocation4], 1 }

</bundles_post_ra>
